<compile_context>
chip_gen: v7x
topology: tpu7x:2x2x1
jax: 0.10.0
libtpu: 0.0.40
codegen_flags: <defaults>
</compile_context>

<pallas_src>
import jax
import jax.numpy as jnp
from jax import lax
from jax.experimental import pallas as pl
from jax.experimental.pallas import tpu as pltpu


def weighting_kernel(x_ref, w_ref, b_ref, o_ref):
    # logits = x @ W^T + b ; contract x's D axis with weight's D axis (W is (E, D)).
    logits = lax.dot_general(
        x_ref[...], w_ref[...],
        dimension_numbers=(((1,), (1,)), ((), ())),
        preferred_element_type=jnp.float32,
    )
    logits = logits + b_ref[...]                      # (TB, E) + (1, E)

    # Numerically-stable softmax over the expert axis (f32 math, exact divide).
    m = jnp.max(logits, axis=-1, keepdims=True)
    e = jnp.exp(logits - m)
    denom = jnp.sum(e, axis=-1, keepdims=True)
    o_ref[...] = (e / denom).astype(o_ref.dtype)
    # TODO(synk): with E << 128 the (TB, E) store is lane-sparse; fusing the
    # downstream expert-combine (or emitting an (E, B) layout for a transposed
    # consumer) would make stores lane-dense, but the module contract is (B, E).


def _round_up(n, m):
    return ((n + m - 1) // m) * m


def _choose_block_b(B, D, E, x_itemsize, max_tb=512):
    """Pick a batch tile: multiple of 8 (up to max_tb), under a conservative
    VMEM budget that is safe on v5e/v6e/v7x."""
    vmem_budget = 16 * 1024 * 1024
    tb = min(max_tb, _round_up(B, 8))
    while tb > 8:
        # 2x double-buffered x tile + 2x out tile + resident W + bias (f32-ish).
        need = 2 * tb * (D + E) * x_itemsize + 2 * (E * D + E) * 4
        if need <= vmem_budget:
            break
        tb //= 2
    return max(tb, 8)


def weighting_network(x, weight, bias, *, max_block_b=512):
    """x: (B, D); weight: (E, D) as in nn.Linear; bias: (E,). Returns (B, E)."""
    B, D = x.shape
    E, D2 = weight.shape
    assert D == D2 and bias.shape == (E,)

    itemsize = jnp.dtype(x.dtype).itemsize
    TB = _choose_block_b(B, D, E, itemsize, max_tb=max_block_b)
    num_blocks = pl.cdiv(B, TB)
    Bp = num_blocks * TB
    if Bp != B:
        # Zero-pad ragged batch; padded rows get softmax(bias) and are dropped.
        x = jnp.pad(x, ((0, Bp - B), (0, 0)))

    b2 = bias.reshape(1, E)

    out = pl.pallas_call(
        weighting_kernel,
        out_shape=jax.ShapeDtypeStruct((Bp, E), x.dtype),
        grid_spec=pltpu.PrefetchScalarGridSpec(
            num_scalar_prefetch=0,
            grid=(num_blocks,),
            in_specs=[
                pl.BlockSpec((TB, D), lambda i: (i, 0)),  # x tile, pipelined over B
                pl.BlockSpec((E, D), lambda i: (0, 0)),   # weight resident in VMEM
                pl.BlockSpec((1, E), lambda i: (0, 0)),   # bias resident in VMEM
            ],
            out_specs=pl.BlockSpec((TB, E), lambda i: (i, 0)),
        ),
        compiler_params=pltpu.CompilerParams(
            dimension_semantics=("parallel",),            # shard batch across TCs (v7x)
        ),
    )(x, weight, b2)

    return out[:B] if Bp != B else out


if __name__ == "__main__":
    # Small shapes consistent with WeightingNetwork(input_dim, num_experts).
    B, input_dim, num_experts = 8, 32, 8

    key = jax.random.PRNGKey(0)
    kx, kw, kb = jax.random.split(key, 3)

    x = jax.random.normal(kx, (B, input_dim), dtype=jnp.float32)
    bound = 1.0 / (input_dim ** 0.5)
    weight = jax.random.uniform(kw, (num_experts, input_dim),
                                minval=-bound, maxval=bound, dtype=jnp.float32)
    bias = jax.random.uniform(kb, (num_experts,),
                              minval=-bound, maxval=bound, dtype=jnp.float32)

    # Single-tile path.
    out = weighting_network(x, weight, bias)
    out = jax.block_until_ready(out)
    ref = jax.nn.softmax(x @ weight.T + bias, axis=-1)
    assert out.shape == (B, num_experts)
    assert jnp.allclose(out, ref, atol=1e-5), "mismatch vs reference (single tile)"
    assert jnp.allclose(jnp.sum(out, axis=-1), 1.0, atol=1e-5)

    # Multi-tile + ragged-batch path (exercises grid, padding, resident weight).
    B2 = 200
    x2 = jax.random.normal(jax.random.PRNGKey(1), (B2, input_dim), dtype=jnp.float32)
    out2 = jax.block_until_ready(weighting_network(x2, weight, bias, max_block_b=64))
    ref2 = jax.nn.softmax(x2 @ weight.T + bias, axis=-1)
    assert out2.shape == (B2, num_experts)
    assert jnp.allclose(out2, ref2, atol=1e-5), "mismatch vs reference (tiled)"
    assert jnp.allclose(jnp.sum(out2, axis=-1), 1.0, atol=1e-5)

    print("KERNEL_OK")
</pallas_src>

<mosaic_0001>
module attributes {stable_mosaic.version = 11 : i64} {
  func.func @weighting_kernel(%arg0: i32, %arg1: memref<8x32xf32, #tpu.memory_space<vmem>>, %arg2: memref<8x32xf32, #tpu.memory_space<vmem>>, %arg3: memref<1x8xf32, #tpu.memory_space<vmem>>, %arg4: memref<8x8xf32, #tpu.memory_space<vmem>>) attributes {dimension_semantics = [#tpu.dimension_semantics<parallel>], iteration_bounds = array<i64: 1>, scalar_prefetch = 0 : i64, scratch_operands = 0 : i64, tpu.core_type = #tpu.core_type<tc>, window_params = [{transform_indices = @transform_0, window_bounds = array<i64: 8, 32>}, {pipeline_mode = #tpu.pipeline_mode<synchronous>, transform_indices = @transform_1, window_bounds = array<i64: 8, 32>}, {pipeline_mode = #tpu.pipeline_mode<synchronous>, transform_indices = @transform_2, window_bounds = array<i64: 1, 8>}, {transform_indices = @transform_3, window_bounds = array<i64: 8, 8>}]} {
    %c0 = arith.constant 0 : index
    %c0_0 = arith.constant 0 : index
    %0 = vector.load %arg1[%c0, %c0_0] : memref<8x32xf32, #tpu.memory_space<vmem>>, vector<8x32xf32>
    %c0_1 = arith.constant 0 : index
    %c0_2 = arith.constant 0 : index
    %1 = vector.load %arg2[%c0_1, %c0_2] : memref<8x32xf32, #tpu.memory_space<vmem>>, vector<8x32xf32>
    %cst = arith.constant dense<0.000000e+00> : vector<8x8xf32>
    %2 = tpu.matmul %0, %1, %cst {dimension_numbers = #tpu.dot_dimension_numbers<[1], [1], [0], [0], [0, 0, 1, 0], [], []>} : vector<8x32xf32>, vector<8x32xf32>, vector<8x8xf32> -> vector<8x8xf32>
    %c0_3 = arith.constant 0 : index
    %c0_4 = arith.constant 0 : index
    %3 = vector.load %arg3[%c0_3, %c0_4] : memref<1x8xf32, #tpu.memory_space<vmem>>, vector<1x8xf32>
    %4 = vector.broadcast %3 : vector<1x8xf32> to vector<8x8xf32>
    %5 = arith.addf %2, %4 : vector<8x8xf32>
    %cst_5 = arith.constant dense<0xFF800000> : vector<8xf32>
    %6 = vector.multi_reduction <maximumf>, %5, %cst_5 [1] : vector<8x8xf32> to vector<8xf32>
    %7 = vector.shape_cast %6 : vector<8xf32> to vector<8x1xf32>
    %8 = vector.broadcast %7 : vector<8x1xf32> to vector<8x8xf32>
    %9 = arith.subf %5, %8 : vector<8x8xf32>
    %10 = math.exp %9 : vector<8x8xf32>
    %cst_6 = arith.constant dense<0.000000e+00> : vector<8xf32>
    %11 = vector.multi_reduction <add>, %10, %cst_6 [1] : vector<8x8xf32> to vector<8xf32>
    %12 = vector.shape_cast %11 : vector<8xf32> to vector<8x1xf32>
    %13 = vector.broadcast %12 : vector<8x1xf32> to vector<8x8xf32>
    %14 = arith.divf %10, %13 : vector<8x8xf32>
    %c0_7 = arith.constant 0 : index
    %c0_8 = arith.constant 0 : index
    %15 = vector.load %arg4[%c0_7, %c0_8] : memref<8x8xf32, #tpu.memory_space<vmem>>, vector<8x8xf32>
    tpu.vector_store %arg4[%c0_7, %c0_8], %14 {strides = array<i32>} : memref<8x8xf32, #tpu.memory_space<vmem>>, vector<8x8xf32>,
    return
  }
  func.func @transform_0(%arg0: i32) -> (i32, i32) {
    %c0_i32 = arith.constant 0 : i32
    %c0_i32_0 = arith.constant 0 : i32
    return %arg0, %c0_i32 : i32, i32
  }
  func.func @transform_1(%arg0: i32) -> (i32, i32) {
    %c0_i32 = arith.constant 0 : i32
    %c0_i32_0 = arith.constant 0 : i32
    %c0_i32_1 = arith.constant 0 : i32
    return %c0_i32, %c0_i32_0 : i32, i32
  }
  func.func @transform_2(%arg0: i32) -> (i32, i32) {
    %c0_i32 = arith.constant 0 : i32
    %c0_i32_0 = arith.constant 0 : i32
    %c0_i32_1 = arith.constant 0 : i32
    return %c0_i32, %c0_i32_0 : i32, i32
  }
  func.func @transform_3(%arg0: i32) -> (i32, i32) {
    %c0_i32 = arith.constant 0 : i32
    %c0_i32_0 = arith.constant 0 : i32
    return %arg0, %c0_i32 : i32, i32
  }
}

</mosaic_0001>

<bundles_post_ra>
// kernel: tpu_custom_call.1
= control target key start
LH: loop header
LB: loop body
LE: loop exit
PB: predicated region body
PF: predicated region fallthrough
CT: control target
= control target key end

     0   :  { %8 = vsyncpa [#allocation3], 0  ;;  %s312_s0 = inlined_call_operand.hbm [shape: f32[8,32], index: 0, kind: input, shape index: {}]   ;;  %s313_s1 = inlined_call_operand.hbm [shape: f32[8,32], index: 1, kind: input, shape index: {}]   ;;  %s314_s2 = inlined_call_operand.vmem [shape: f32[1,8], index: 2, kind: input, shape index: {}]   ;;  %s315_s3 = inlined_call_operand.hbm [shape: f32[8,8], index: 3, kind: output, shape index: {}]  }
   0x1   :  { %9 = vsyncpa [#allocation6], 0 }
   0x2   :  { %10 = vsyncpa [#allocation4], 0  ;;  %s245_s12 = smov [#allocation2]   ;;  %s246_s14 = smov [#allocation5]  }
   0x3   :  { %s17_s13 = sshll.u32 %s245_s12, 4  ;;  %s27_s15 = sshll.u32 %s246_s14, 4  ;;  %s18_s13 = int_to_ptr.vmem [resolvable:$true] %s17_s13  ;;  %s28_s15 = int_to_ptr.vmem [resolvable:$true] %s27_s15 }
   0x4   :  { %s173_s18 = scalar_lea.hbm %s312_s0, 128 }
   0x5   :  { %p174_p0 = scmp.ne.s32.totalorder %s312_s0, %s173_s18  ;;  %p177_p1 = scmp.lt.u32.totalorder %s173_s18, %s312_s0 }
   0x7   :  { %p179_p2 = pnand %p177_p1, %p174_p0 }
   0x9   :  { %182 = shalt.err (!%p179_p2)
}
   0xa   :  { %s183_s23 = scalar_lea.vmem %s18_s13, 128  ;;  %p188_p4 = scmp.lt.s32.totalorder %s18_s13, %s18_s13 }
   0xb   :  { %p184_p3 = scmp.ne.s32.totalorder %s18_s13, %s183_s23  ;;  %p189_p5 = scmp.lt.s32.totalorder %s183_s23, %s183_s23 }
   0xd   :  { %p190_p6 = por %p189_p5, %p188_p4 }
   0xf   :  { %p191_p7 = pnand %p190_p6, %p184_p3 }
  0x11   :  { %194 = shalt.err (!%p191_p7)
}
  0x12   :  { %20 = dma.hbm_to_vmem [thread:$0]  %s312_s0, 128, %s18_s13, [#allocation3]  }
  0x13   :  { %s195_s28 = scalar_lea.hbm %s313_s1, 128 }
  0x14   :  { %p196_p8 = scmp.ne.s32.totalorder %s313_s1, %s195_s28  ;;  %p199_p9 = scmp.lt.u32.totalorder %s195_s28, %s313_s1 }
  0x16   :  { %p201_p10 = pnand %p199_p9, %p196_p8 }
  0x18   :  { %204 = shalt.err (!%p201_p10)
}
  0x19   :  { %s205_s6 = scalar_lea.vmem %s28_s15, 128  ;;  %p210_p12 = scmp.lt.s32.totalorder %s28_s15, %s28_s15 }
  0x1a   :  { %p206_p11 = scmp.ne.s32.totalorder %s28_s15, %s205_s6  ;;  %p211_p13 = scmp.lt.s32.totalorder %s205_s6, %s205_s6 }
  0x1c   :  { %p212_p0 = por %p211_p13, %p210_p12 }
  0x1e   :  { %p213_p1 = pnand %p212_p0, %p206_p11 }
  0x20   :  { %216 = shalt.err (!%p213_p1)
}
  0x21   :  { %30 = dma.hbm_to_vmem [thread:$0]  %s313_s1, 128, %s28_s15, [#allocation6]  }
  0x22   :  { %239 = dma.done.wait [#allocation3], 128  }
  0x23   :  { %240 = vsyncadd [#allocation3], 4294967168 }
  0x24   :  { %241 = dma.done.wait [#allocation6], 128  }
  0x25   :  { %242 = vsyncadd [#allocation6], 4294967168  ;;  %v247_v0 = vmov 0.0   ;;  %vm248_vm0 = vmmov 0   ;;  %vm48_vm1 = vcmask 261120   ;;  %v40_v1 = vld [vmem:[#allocation5] sm:$0xff] }
  0x26   :  { %159 = vmatprep.subr.mxu0 %v247_v0  ;;  %161 = vmatprep.mubr.msk.f32.mxu0 %vm248_vm0, %v247_v0  ;;  %v39_v2 = vld [vmem:[#allocation2] sm:$0xff]  ;;  %vm125_vm2 = vcmask 64512   ;;  %s249_s1 = smov [#allocation7]  }
  0x27   :  { %160 = vmatpush3.xpose.msk.msra.mxu0 %vm48_vm1, %v40_v1  ;;  %v154_v3 = vld [vmem:[%s314_s2] ss:$0 sm:$0xff]  ;;  %s144_s10 = sshll.u32 %s249_s1, 4  ;;  %s145_s10 = int_to_ptr.vmem [resolvable:$true] %s144_s10 }
  0x28   :  { %s217_s2 = scalar_lea.vmem %s145_s10, 128  ;;  %p222_p3 = scmp.lt.s32.totalorder %s145_s10, %s145_s10 }
  0x29   :  { %p218_p2 = scmp.ne.s32.totalorder %s145_s10, %s217_s2  ;;  %p223_p4 = scmp.lt.s32.totalorder %s217_s2, %s217_s2 }
  0x2a   :  { %162 = vmatmul.mubr.msk.f32.vlgmr.msra.gmra.mrb[0].mxu0 %vm48_vm1, %v39_v2 }
  0x2b   :  { %p224_p5 = por %p223_p4, %p222_p3 }
  0x2d   :  { %p225_p6 = pnand %p224_p5, %p218_p2 }
  0xfd   :  { %v121_v4 = vpop.f32.mrb[0].mxu0 }
  0xfe   :  { %v122_v5 = vadd.f32 %v154_v3, %v121_v4  ;;  %v163_v6 = vpop.f32.mrb[1].mxu0 }
 0x100   :  { %v126_v7 = vsel %vm125_vm2, %v122_v5, -inf }
 0x101   :  { %127 = vmax.xlane.f32.xlu0 %v126_v7 }
 0x18e   :  { %v128_v8 = vpop.xlane.xlu0 %127 }
 0x18f   :  { %v129_v9 = vsub.f32 %v122_v5, %v128_v8 }
 0x191   :  { %v130_v10 = vmul.f32 1.442695, %v129_v9 }
 0x193   :  { %169 = vpow2.f32 %v130_v10 }
 0x19d   :  { %v170_v11 = vpop.eup %169 }
 0x19e   :  { %v132_v12 = vsel %vm125_vm2, %v170_v11, 0.0 }
 0x19f   :  { %133 = vadd.xlane.f32.xlu0 %v132_v12 }
 0x22c   :  { %v134_v13 = vpop.xlane.xlu0 %133 }
 0x22d   :  { %171 = vrcp.f32 %v134_v13 }
 0x237   :  { %v172_v14 = vpop.eup %171 }
 0x238   :  { %v136_v15 = vmul.f32 %v172_v14, %v170_v11 }
 0x23a   :  { %137 = vst.msk [vmem:[#allocation7] sm:$0xff] %vm125_vm2, %v136_v15 }
 0x23b   :  { %228 = shalt.err (!%p225_p6)
}
 0x23c   :  { %s229_s13 = scalar_lea.hbm %s315_s3, 128 }
 0x23d   :  { %p230_p7 = scmp.ne.s32.totalorder %s315_s3, %s229_s13  ;;  %p233_p8 = scmp.lt.u32.totalorder %s229_s13, %s315_s3 }
 0x23f   :  { %p235_p9 = pnand %p233_p8, %p230_p7 }
 0x241   :  { %238 = shalt.err (!%p235_p9)
}
 0x242   :  { %147 = dma.vmem_to_hbm [thread:$0]  %s145_s10, 128, %s315_s3, [#allocation4]  }
 0x243   :  { %243 = dma.done.wait [#allocation4], 128  }
 0x244   :  { %244 = vsyncadd [#allocation4], 4294967168 }
 0x245   :  { %151 = vsyncpa [#allocation3], 1 }
 0x246   :  { %152 = vsyncpa [#allocation6], 1 }
 0x247   :  { %153 = vsyncpa [#allocation4], 1 }

</bundles_post_ra>
